<compile_context>
chip_gen: v7x
topology: tpu7x:2x2x1
jax: 0.10.0
libtpu: 0.0.40
codegen_flags: <defaults>
</compile_context>

<pallas_src>
import functools

import numpy as np
import jax
import jax.numpy as jnp
from jax.experimental import pallas as pl
from jax.experimental.pallas import tpu as pltpu


def _round_up(v, m):
    return (v + m - 1) // m * m


def _sigmoid(x):
    # explicit formula so kernel and reference match and lowering is trivial
    return 1.0 / (1.0 + jnp.exp(-x))


def _bottleneck(w1_ref, w2_ref, w3_ref, v):
    """SparseBottleneck on channel-first features v: [C_in, TN] -> [C_out, TN]."""
    # TODO(synk): kernel_size>1 MinkowskiConvolution needs the sparse kernel map
    # (coordinate-manager neighbor gather); only the per-point (center-tap /
    # 1x1) channel mixing is implemented here.
    h = jnp.dot(w1_ref[...], v, preferred_element_type=jnp.float32)
    h = jnp.where(h > 0, h, 0.2 * h)            # MinkowskiLeakyReLU(0.2)
    h = jnp.dot(w2_ref[...], h, preferred_element_type=jnp.float32)
    h = jnp.where(h > 0, h, 0.2 * h)
    return jnp.dot(w3_ref[...], h, preferred_element_type=jnp.float32)


def _coupling_kernel(x1_ref, x2_ref,
                     g1w1, g1w2, g1w3,
                     g2w1, g2w2, g2w3,
                     h1w1, h1w2, h1w3,
                     h2w1, h2w2, h2w3,
                     y1_ref, y2_ref, *, clamp, reverse):
    def scale(s):
        return jnp.exp(clamp * (_sigmoid(s) * 2.0 - 1.0))

    x1 = x1_ref[...].astype(jnp.float32)   # [C1, TN]
    x2 = x2_ref[...].astype(jnp.float32)   # [C2, TN]

    if not reverse:
        y1 = x1 * scale(_bottleneck(g2w1, g2w2, g2w3, x2)) \
             + _bottleneck(h2w1, h2w2, h2w3, x2)
        y2 = x2 * scale(_bottleneck(g1w1, g1w2, g1w3, y1)) \
             + _bottleneck(h1w1, h1w2, h1w3, y1)
    else:
        y2 = (x2 - _bottleneck(h1w1, h1w2, h1w3, x1)) \
             / scale(_bottleneck(g1w1, g1w2, g1w3, x1))
        y1 = (x1 - _bottleneck(h2w1, h2w2, h2w3, y2)) \
             / scale(_bottleneck(g2w1, g2w2, g2w3, y2))

    y1_ref[...] = y1.astype(y1_ref.dtype)
    y2_ref[...] = y2.astype(y2_ref.dtype)


def sparse_coupling_layer_cf(x1, x2, params, *, clamp=1.0, reverse=False,
                             tile_n=512):
    """Channel-first fast path.

    x1: [C1, N], x2: [C2, N] float32 (== x.F.T split along channels).
    Returns (y1, y2) with the same shapes.
    """
    c1, n = x1.shape
    c2, n2 = x2.shape
    assert n == n2, "x1/x2 must cover the same sparse points"

    # Lane-dense tiling along the point axis N.  Keep the tile a multiple of
    # 128 and cap it so the grid keeps >=2 steps when N allows it (v7x has
    # 2 TensorCores to shard the 'parallel' axis across).
    tile_n = _round_up(max(int(tile_n), 128), 128)
    if n >= 256:
        tile_n = min(tile_n, _round_up(n // 2, 128))
    else:
        tile_n = min(tile_n, _round_up(n, 128))

    # N-remainder: zero-pad the lane axis (padded columns are sliced off below).
    n_padded = _round_up(n, tile_n)
    if n_padded != n:
        x1 = jnp.pad(x1, ((0, 0), (0, n_padded - n)))
        x2 = jnp.pad(x2, ((0, 0), (0, n_padded - n)))

    flat_w = (list(params["G1"]) + list(params["G2"])
              + list(params["H1"]) + list(params["H2"]))
    # Tiny, grid-invariant weights: full-array blocks, resident across the grid.
    w_specs = [pl.BlockSpec(w.shape, lambda i: (0, 0)) for w in flat_w]

    grid = (n_padded // tile_n,)
    y1, y2 = pl.pallas_call(
        functools.partial(_coupling_kernel, clamp=float(clamp),
                          reverse=bool(reverse)),
        out_shape=(jax.ShapeDtypeStruct((c1, n_padded), x1.dtype),
                   jax.ShapeDtypeStruct((c2, n_padded), x2.dtype)),
        grid_spec=pltpu.PrefetchScalarGridSpec(
            num_scalar_prefetch=0,
            grid=grid,
            in_specs=[pl.BlockSpec((c1, tile_n), lambda i: (0, i)),
                      pl.BlockSpec((c2, tile_n), lambda i: (0, i))] + w_specs,
            out_specs=[pl.BlockSpec((c1, tile_n), lambda i: (0, i)),
                       pl.BlockSpec((c2, tile_n), lambda i: (0, i))],
        ),
        compiler_params=pltpu.CompilerParams(
            dimension_semantics=("parallel",)),
    )(x1, x2, *flat_w)

    if n_padded != n:
        y1 = y1[:, :n]
        y2 = y2[:, :n]
    return y1, y2


def sparse_coupling_layer(features, params, *, clamp=1.0, reverse=False,
                          tile_n=512):
    """features: [N, C1+C2] == rows of the sparse tensor's feature matrix x.F.

    # TODO(synk): the MinkowskiEngine sparse-tensor bookkeeping (_wrap_tensor /
    # ME.cat coordinate metadata) has no Pallas equivalent; only the feature
    # math is implemented.
    """
    c1 = params["G1"][0].shape[1]       # G1 takes split_len1 channels in
    # layout glue: channel-first so the lane axis inside the kernel is N
    x1 = features[:, :c1].T
    x2 = features[:, c1:].T
    y1, y2 = sparse_coupling_layer_cf(x1, x2, params, clamp=clamp,
                                      reverse=reverse, tile_n=tile_n)
    return jnp.concatenate([y1.T, y2.T], axis=1)


# ----------------------------- pure-JAX reference ---------------------------

def _bottleneck_ref(w, v):
    w1, w2, w3 = w
    h = v @ w1.T
    h = jnp.where(h > 0, h, 0.2 * h)
    h = h @ w2.T
    h = jnp.where(h > 0, h, 0.2 * h)
    return h @ w3.T


def sparse_coupling_layer_ref(features, params, *, clamp=1.0, reverse=False):
    c1 = params["G1"][0].shape[1]
    x1 = features[:, :c1]
    x2 = features[:, c1:]
    s = lambda t: jnp.exp(clamp * (_sigmoid(t) * 2.0 - 1.0))
    if not reverse:
        y1 = x1 * s(_bottleneck_ref(params["G2"], x2)) + _bottleneck_ref(params["H2"], x2)
        y2 = x2 * s(_bottleneck_ref(params["G1"], y1)) + _bottleneck_ref(params["H1"], y1)
    else:
        y2 = (x2 - _bottleneck_ref(params["H1"], x1)) / s(_bottleneck_ref(params["G1"], x1))
        y1 = (x1 - _bottleneck_ref(params["H2"], y2)) / s(_bottleneck_ref(params["G2"], y2))
    return jnp.concatenate([y1, y2], axis=1)


def init_params(key, split_len1, split_len2, scale=0.2):
    """Weights W: [C_out, C_in] for each of the 3 convs of each bottleneck.

    NOTE: the PyTorch module zero-inits conv3 of every bottleneck; random
    weights are used here so the test exercises the full math.
    """
    def bottleneck_params(k, cin, cout):
        k1, k2, k3 = jax.random.split(k, 3)
        return (scale * jax.random.normal(k1, (cout, cin), jnp.float32),
                scale * jax.random.normal(k2, (cout, cout), jnp.float32),
                scale * jax.random.normal(k3, (cout, cout), jnp.float32))
    kg1, kg2, kh1, kh2 = jax.random.split(key, 4)
    return {
        "G1": bottleneck_params(kg1, split_len1, split_len2),
        "G2": bottleneck_params(kg2, split_len2, split_len1),
        "H1": bottleneck_params(kh1, split_len1, split_len2),
        "H2": bottleneck_params(kh2, split_len2, split_len1),
    }


if __name__ == "__main__":
    split_len1, split_len2 = 4, 4
    num_points = 1024            # rows of the sparse tensor's feature matrix .F
    clamp = 1.0

    key = jax.random.PRNGKey(0)
    k_feat, k_par = jax.random.split(key)
    features = jax.random.normal(
        k_feat, (num_points, split_len1 + split_len2), dtype=jnp.float32)
    params = init_params(k_par, split_len1, split_len2)

    # forward pass (kernel vs pure-JAX reference)
    y = sparse_coupling_layer(features, params, clamp=clamp, reverse=False)
    y = jax.block_until_ready(y)
    y_ref = sparse_coupling_layer_ref(features, params, clamp=clamp, reverse=False)
    np.testing.assert_allclose(np.asarray(y), np.asarray(y_ref),
                               rtol=1e-4, atol=1e-4)

    # reverse pass must algebraically invert the forward pass (no matrix
    # inverse involved -- unlike a 1x1-conv flow layer)
    x_rec = sparse_coupling_layer(y, params, clamp=clamp, reverse=True)
    x_rec = jax.block_until_ready(x_rec)
    np.testing.assert_allclose(np.asarray(x_rec), np.asarray(features),
                               rtol=1e-4, atol=1e-4)

    print("KERNEL_OK")
</pallas_src>

<mosaic_0001>
module attributes {stable_mosaic.version = 11 : i64} {
  func.func @_coupling_kernel(%arg0: i32, %arg1: memref<4x512xf32, #tpu.memory_space<vmem>>, %arg2: memref<4x512xf32, #tpu.memory_space<vmem>>, %arg3: memref<4x4xf32, #tpu.memory_space<vmem>>, %arg4: memref<4x4xf32, #tpu.memory_space<vmem>>, %arg5: memref<4x4xf32, #tpu.memory_space<vmem>>, %arg6: memref<4x4xf32, #tpu.memory_space<vmem>>, %arg7: memref<4x4xf32, #tpu.memory_space<vmem>>, %arg8: memref<4x4xf32, #tpu.memory_space<vmem>>, %arg9: memref<4x4xf32, #tpu.memory_space<vmem>>, %arg10: memref<4x4xf32, #tpu.memory_space<vmem>>, %arg11: memref<4x4xf32, #tpu.memory_space<vmem>>, %arg12: memref<4x4xf32, #tpu.memory_space<vmem>>, %arg13: memref<4x4xf32, #tpu.memory_space<vmem>>, %arg14: memref<4x4xf32, #tpu.memory_space<vmem>>, %arg15: memref<4x512xf32, #tpu.memory_space<vmem>>, %arg16: memref<4x512xf32, #tpu.memory_space<vmem>>) attributes {dimension_semantics = [#tpu.dimension_semantics<parallel>], iteration_bounds = array<i64: 2>, scalar_prefetch = 0 : i64, scratch_operands = 0 : i64, tpu.core_type = #tpu.core_type<tc>, window_params = [{transform_indices = @transform_0, window_bounds = array<i64: 4, 512>}, {transform_indices = @transform_1, window_bounds = array<i64: 4, 512>}, {pipeline_mode = #tpu.pipeline_mode<synchronous>, transform_indices = @transform_2, window_bounds = array<i64: 4, 4>}, {pipeline_mode = #tpu.pipeline_mode<synchronous>, transform_indices = @transform_3, window_bounds = array<i64: 4, 4>}, {pipeline_mode = #tpu.pipeline_mode<synchronous>, transform_indices = @transform_4, window_bounds = array<i64: 4, 4>}, {pipeline_mode = #tpu.pipeline_mode<synchronous>, transform_indices = @transform_5, window_bounds = array<i64: 4, 4>}, {pipeline_mode = #tpu.pipeline_mode<synchronous>, transform_indices = @transform_6, window_bounds = array<i64: 4, 4>}, {pipeline_mode = #tpu.pipeline_mode<synchronous>, transform_indices = @transform_7, window_bounds = array<i64: 4, 4>}, {pipeline_mode = #tpu.pipeline_mode<synchronous>, transform_indices = @transform_8, window_bounds = array<i64: 4, 4>}, {pipeline_mode = #tpu.pipeline_mode<synchronous>, transform_indices = @transform_9, window_bounds = array<i64: 4, 4>}, {pipeline_mode = #tpu.pipeline_mode<synchronous>, transform_indices = @transform_10, window_bounds = array<i64: 4, 4>}, {pipeline_mode = #tpu.pipeline_mode<synchronous>, transform_indices = @transform_11, window_bounds = array<i64: 4, 4>}, {pipeline_mode = #tpu.pipeline_mode<synchronous>, transform_indices = @transform_12, window_bounds = array<i64: 4, 4>}, {pipeline_mode = #tpu.pipeline_mode<synchronous>, transform_indices = @transform_13, window_bounds = array<i64: 4, 4>}, {transform_indices = @transform_14, window_bounds = array<i64: 4, 512>}, {transform_indices = @transform_15, window_bounds = array<i64: 4, 512>}]} {
    %c0 = arith.constant 0 : index
    %c0_0 = arith.constant 0 : index
    %0 = vector.load %arg1[%c0, %c0_0] : memref<4x512xf32, #tpu.memory_space<vmem>>, vector<4x512xf32>
    %c0_1 = arith.constant 0 : index
    %c0_2 = arith.constant 0 : index
    %1 = vector.load %arg2[%c0_1, %c0_2] : memref<4x512xf32, #tpu.memory_space<vmem>>, vector<4x512xf32>
    %c0_3 = arith.constant 0 : index
    %c0_4 = arith.constant 0 : index
    %2 = vector.load %arg6[%c0_3, %c0_4] : memref<4x4xf32, #tpu.memory_space<vmem>>, vector<4x4xf32>
    %cst = arith.constant dense<0.000000e+00> : vector<4x512xf32>
    %3 = tpu.matmul %2, %1, %cst {dimension_numbers = #tpu.dot_dimension_numbers<[1], [0], [0], [1], [0, 0, 1, 1], [], []>} : vector<4x4xf32>, vector<4x512xf32>, vector<4x512xf32> -> vector<4x512xf32>
    %cst_5 = arith.constant 0.000000e+00 : f32
    %4 = vector.broadcast %cst_5 : f32 to vector<4x512xf32>
    %5 = arith.cmpf ogt, %3, %4 : vector<4x512xf32>
    %cst_6 = arith.constant 2.000000e-01 : f32
    %6 = vector.broadcast %cst_6 : f32 to vector<4x512xf32>
    %7 = arith.mulf %6, %3 : vector<4x512xf32>
    %8 = arith.select %5, %3, %7 : vector<4x512xi1>, vector<4x512xf32>
    %c0_7 = arith.constant 0 : index
    %c0_8 = arith.constant 0 : index
    %9 = vector.load %arg7[%c0_7, %c0_8] : memref<4x4xf32, #tpu.memory_space<vmem>>, vector<4x4xf32>
    %cst_9 = arith.constant dense<0.000000e+00> : vector<4x512xf32>
    %10 = tpu.matmul %9, %8, %cst_9 {dimension_numbers = #tpu.dot_dimension_numbers<[1], [0], [0], [1], [0, 0, 1, 1], [], []>} : vector<4x4xf32>, vector<4x512xf32>, vector<4x512xf32> -> vector<4x512xf32>
    %cst_10 = arith.constant 0.000000e+00 : f32
    %11 = vector.broadcast %cst_10 : f32 to vector<4x512xf32>
    %12 = arith.cmpf ogt, %10, %11 : vector<4x512xf32>
    %cst_11 = arith.constant 2.000000e-01 : f32
    %13 = vector.broadcast %cst_11 : f32 to vector<4x512xf32>
    %14 = arith.mulf %13, %10 : vector<4x512xf32>
    %15 = arith.select %12, %10, %14 : vector<4x512xi1>, vector<4x512xf32>
    %c0_12 = arith.constant 0 : index
    %c0_13 = arith.constant 0 : index
    %16 = vector.load %arg8[%c0_12, %c0_13] : memref<4x4xf32, #tpu.memory_space<vmem>>, vector<4x4xf32>
    %cst_14 = arith.constant dense<0.000000e+00> : vector<4x512xf32>
    %17 = tpu.matmul %16, %15, %cst_14 {dimension_numbers = #tpu.dot_dimension_numbers<[1], [0], [0], [1], [0, 0, 1, 1], [], []>} : vector<4x4xf32>, vector<4x512xf32>, vector<4x512xf32> -> vector<4x512xf32>
    %cst_15 = arith.constant 0.000000e+00 : f32
    %18 = vector.broadcast %cst_15 : f32 to vector<4x512xf32>
    %19 = arith.subf %18, %17 : vector<4x512xf32>
    %20 = math.exp %19 : vector<4x512xf32>
    %cst_16 = arith.constant 1.000000e+00 : f32
    %21 = vector.broadcast %cst_16 : f32 to vector<4x512xf32>
    %22 = arith.addf %21, %20 : vector<4x512xf32>
    %cst_17 = arith.constant 1.000000e+00 : f32
    %23 = vector.broadcast %cst_17 : f32 to vector<4x512xf32>
    %24 = arith.divf %23, %22 : vector<4x512xf32>
    %cst_18 = arith.constant 2.000000e+00 : f32
    %25 = vector.broadcast %cst_18 : f32 to vector<4x512xf32>
    %26 = arith.mulf %24, %25 : vector<4x512xf32>
    %cst_19 = arith.constant 1.000000e+00 : f32
    %27 = vector.broadcast %cst_19 : f32 to vector<4x512xf32>
    %28 = arith.subf %26, %27 : vector<4x512xf32>
    %cst_20 = arith.constant 1.000000e+00 : f32
    %29 = vector.broadcast %cst_20 : f32 to vector<4x512xf32>
    %30 = arith.mulf %29, %28 : vector<4x512xf32>
    %31 = math.exp %30 : vector<4x512xf32>
    %32 = arith.mulf %0, %31 : vector<4x512xf32>
    %c0_21 = arith.constant 0 : index
    %c0_22 = arith.constant 0 : index
    %33 = vector.load %arg12[%c0_21, %c0_22] : memref<4x4xf32, #tpu.memory_space<vmem>>, vector<4x4xf32>
    %cst_23 = arith.constant dense<0.000000e+00> : vector<4x512xf32>
    %34 = tpu.matmul %33, %1, %cst_23 {dimension_numbers = #tpu.dot_dimension_numbers<[1], [0], [0], [1], [0, 0, 1, 1], [], []>} : vector<4x4xf32>, vector<4x512xf32>, vector<4x512xf32> -> vector<4x512xf32>
    %cst_24 = arith.constant 0.000000e+00 : f32
    %35 = vector.broadcast %cst_24 : f32 to vector<4x512xf32>
    %36 = arith.cmpf ogt, %34, %35 : vector<4x512xf32>
    %cst_25 = arith.constant 2.000000e-01 : f32
    %37 = vector.broadcast %cst_25 : f32 to vector<4x512xf32>
    %38 = arith.mulf %37, %34 : vector<4x512xf32>
    %39 = arith.select %36, %34, %38 : vector<4x512xi1>, vector<4x512xf32>
    %c0_26 = arith.constant 0 : index
    %c0_27 = arith.constant 0 : index
    %40 = vector.load %arg13[%c0_26, %c0_27] : memref<4x4xf32, #tpu.memory_space<vmem>>, vector<4x4xf32>
    %cst_28 = arith.constant dense<0.000000e+00> : vector<4x512xf32>
    %41 = tpu.matmul %40, %39, %cst_28 {dimension_numbers = #tpu.dot_dimension_numbers<[1], [0], [0], [1], [0, 0, 1, 1], [], []>} : vector<4x4xf32>, vector<4x512xf32>, vector<4x512xf32> -> vector<4x512xf32>
    %cst_29 = arith.constant 0.000000e+00 : f32
    %42 = vector.broadcast %cst_29 : f32 to vector<4x512xf32>
    %43 = arith.cmpf ogt, %41, %42 : vector<4x512xf32>
    %cst_30 = arith.constant 2.000000e-01 : f32
    %44 = vector.broadcast %cst_30 : f32 to vector<4x512xf32>
    %45 = arith.mulf %44, %41 : vector<4x512xf32>
    %46 = arith.select %43, %41, %45 : vector<4x512xi1>, vector<4x512xf32>
    %c0_31 = arith.constant 0 : index
    %c0_32 = arith.constant 0 : index
    %47 = vector.load %arg14[%c0_31, %c0_32] : memref<4x4xf32, #tpu.memory_space<vmem>>, vector<4x4xf32>
    %cst_33 = arith.constant dense<0.000000e+00> : vector<4x512xf32>
    %48 = tpu.matmul %47, %46, %cst_33 {dimension_numbers = #tpu.dot_dimension_numbers<[1], [0], [0], [1], [0, 0, 1, 1], [], []>} : vector<4x4xf32>, vector<4x512xf32>, vector<4x512xf32> -> vector<4x512xf32>
    %49 = arith.addf %32, %48 : vector<4x512xf32>
    %c0_34 = arith.constant 0 : index
    %c0_35 = arith.constant 0 : index
    %50 = vector.load %arg3[%c0_34, %c0_35] : memref<4x4xf32, #tpu.memory_space<vmem>>, vector<4x4xf32>
    %cst_36 = arith.constant dense<0.000000e+00> : vector<4x512xf32>
    %51 = tpu.matmul %50, %49, %cst_36 {dimension_numbers = #tpu.dot_dimension_numbers<[1], [0], [0], [1], [0, 0, 1, 1], [], []>} : vector<4x4xf32>, vector<4x512xf32>, vector<4x512xf32> -> vector<4x512xf32>
    %cst_37 = arith.constant 0.000000e+00 : f32
    %52 = vector.broadcast %cst_37 : f32 to vector<4x512xf32>
    %53 = arith.cmpf ogt, %51, %52 : vector<4x512xf32>
    %cst_38 = arith.constant 2.000000e-01 : f32
    %54 = vector.broadcast %cst_38 : f32 to vector<4x512xf32>
    %55 = arith.mulf %54, %51 : vector<4x512xf32>
    %56 = arith.select %53, %51, %55 : vector<4x512xi1>, vector<4x512xf32>
    %c0_39 = arith.constant 0 : index
    %c0_40 = arith.constant 0 : index
    %57 = vector.load %arg4[%c0_39, %c0_40] : memref<4x4xf32, #tpu.memory_space<vmem>>, vector<4x4xf32>
    %cst_41 = arith.constant dense<0.000000e+00> : vector<4x512xf32>
    %58 = tpu.matmul %57, %56, %cst_41 {dimension_numbers = #tpu.dot_dimension_numbers<[1], [0], [0], [1], [0, 0, 1, 1], [], []>} : vector<4x4xf32>, vector<4x512xf32>, vector<4x512xf32> -> vector<4x512xf32>
    %cst_42 = arith.constant 0.000000e+00 : f32
    %59 = vector.broadcast %cst_42 : f32 to vector<4x512xf32>
    %60 = arith.cmpf ogt, %58, %59 : vector<4x512xf32>
    %cst_43 = arith.constant 2.000000e-01 : f32
    %61 = vector.broadcast %cst_43 : f32 to vector<4x512xf32>
    %62 = arith.mulf %61, %58 : vector<4x512xf32>
    %63 = arith.select %60, %58, %62 : vector<4x512xi1>, vector<4x512xf32>
    %c0_44 = arith.constant 0 : index
    %c0_45 = arith.constant 0 : index
    %64 = vector.load %arg5[%c0_44, %c0_45] : memref<4x4xf32, #tpu.memory_space<vmem>>, vector<4x4xf32>
    %cst_46 = arith.constant dense<0.000000e+00> : vector<4x512xf32>
    %65 = tpu.matmul %64, %63, %cst_46 {dimension_numbers = #tpu.dot_dimension_numbers<[1], [0], [0], [1], [0, 0, 1, 1], [], []>} : vector<4x4xf32>, vector<4x512xf32>, vector<4x512xf32> -> vector<4x512xf32>
    %cst_47 = arith.constant 0.000000e+00 : f32
    %66 = vector.broadcast %cst_47 : f32 to vector<4x512xf32>
    %67 = arith.subf %66, %65 : vector<4x512xf32>
    %68 = math.exp %67 : vector<4x512xf32>
    %cst_48 = arith.constant 1.000000e+00 : f32
    %69 = vector.broadcast %cst_48 : f32 to vector<4x512xf32>
    %70 = arith.addf %69, %68 : vector<4x512xf32>
    %cst_49 = arith.constant 1.000000e+00 : f32
    %71 = vector.broadcast %cst_49 : f32 to vector<4x512xf32>
    %72 = arith.divf %71, %70 : vector<4x512xf32>
    %cst_50 = arith.constant 2.000000e+00 : f32
    %73 = vector.broadcast %cst_50 : f32 to vector<4x512xf32>
    %74 = arith.mulf %72, %73 : vector<4x512xf32>
    %cst_51 = arith.constant 1.000000e+00 : f32
    %75 = vector.broadcast %cst_51 : f32 to vector<4x512xf32>
    %76 = arith.subf %74, %75 : vector<4x512xf32>
    %cst_52 = arith.constant 1.000000e+00 : f32
    %77 = vector.broadcast %cst_52 : f32 to vector<4x512xf32>
    %78 = arith.mulf %77, %76 : vector<4x512xf32>
    %79 = math.exp %78 : vector<4x512xf32>
    %80 = arith.mulf %1, %79 : vector<4x512xf32>
    %c0_53 = arith.constant 0 : index
    %c0_54 = arith.constant 0 : index
    %81 = vector.load %arg9[%c0_53, %c0_54] : memref<4x4xf32, #tpu.memory_space<vmem>>, vector<4x4xf32>
    %cst_55 = arith.constant dense<0.000000e+00> : vector<4x512xf32>
    %82 = tpu.matmul %81, %49, %cst_55 {dimension_numbers = #tpu.dot_dimension_numbers<[1], [0], [0], [1], [0, 0, 1, 1], [], []>} : vector<4x4xf32>, vector<4x512xf32>, vector<4x512xf32> -> vector<4x512xf32>
    %cst_56 = arith.constant 0.000000e+00 : f32
    %83 = vector.broadcast %cst_56 : f32 to vector<4x512xf32>
    %84 = arith.cmpf ogt, %82, %83 : vector<4x512xf32>
    %cst_57 = arith.constant 2.000000e-01 : f32
    %85 = vector.broadcast %cst_57 : f32 to vector<4x512xf32>
    %86 = arith.mulf %85, %82 : vector<4x512xf32>
    %87 = arith.select %84, %82, %86 : vector<4x512xi1>, vector<4x512xf32>
    %c0_58 = arith.constant 0 : index
    %c0_59 = arith.constant 0 : index
    %88 = vector.load %arg10[%c0_58, %c0_59] : memref<4x4xf32, #tpu.memory_space<vmem>>, vector<4x4xf32>
    %cst_60 = arith.constant dense<0.000000e+00> : vector<4x512xf32>
    %89 = tpu.matmul %88, %87, %cst_60 {dimension_numbers = #tpu.dot_dimension_numbers<[1], [0], [0], [1], [0, 0, 1, 1], [], []>} : vector<4x4xf32>, vector<4x512xf32>, vector<4x512xf32> -> vector<4x512xf32>
    %cst_61 = arith.constant 0.000000e+00 : f32
    %90 = vector.broadcast %cst_61 : f32 to vector<4x512xf32>
    %91 = arith.cmpf ogt, %89, %90 : vector<4x512xf32>
    %cst_62 = arith.constant 2.000000e-01 : f32
    %92 = vector.broadcast %cst_62 : f32 to vector<4x512xf32>
    %93 = arith.mulf %92, %89 : vector<4x512xf32>
    %94 = arith.select %91, %89, %93 : vector<4x512xi1>, vector<4x512xf32>
    %c0_63 = arith.constant 0 : index
    %c0_64 = arith.constant 0 : index
    %95 = vector.load %arg11[%c0_63, %c0_64] : memref<4x4xf32, #tpu.memory_space<vmem>>, vector<4x4xf32>
    %cst_65 = arith.constant dense<0.000000e+00> : vector<4x512xf32>
    %96 = tpu.matmul %95, %94, %cst_65 {dimension_numbers = #tpu.dot_dimension_numbers<[1], [0], [0], [1], [0, 0, 1, 1], [], []>} : vector<4x4xf32>, vector<4x512xf32>, vector<4x512xf32> -> vector<4x512xf32>
    %97 = arith.addf %80, %96 : vector<4x512xf32>
    %c0_66 = arith.constant 0 : index
    %c0_67 = arith.constant 0 : index
    %98 = vector.load %arg15[%c0_66, %c0_67] : memref<4x512xf32, #tpu.memory_space<vmem>>, vector<4x512xf32>
    tpu.vector_store %arg15[%c0_66, %c0_67], %49 {strides = array<i32>} : memref<4x512xf32, #tpu.memory_space<vmem>>, vector<4x512xf32>,
    %c0_68 = arith.constant 0 : index
    %c0_69 = arith.constant 0 : index
    %99 = vector.load %arg16[%c0_68, %c0_69] : memref<4x512xf32, #tpu.memory_space<vmem>>, vector<4x512xf32>
    tpu.vector_store %arg16[%c0_68, %c0_69], %97 {strides = array<i32>} : memref<4x512xf32, #tpu.memory_space<vmem>>, vector<4x512xf32>,
    return
  }
  func.func @transform_0(%arg0: i32) -> (i32, i32) {
    %c0_i32 = arith.constant 0 : i32
    %c0_i32_0 = arith.constant 0 : i32
    return %c0_i32, %arg0 : i32, i32
  }
  func.func @transform_1(%arg0: i32) -> (i32, i32) {
    %c0_i32 = arith.constant 0 : i32
    %c0_i32_0 = arith.constant 0 : i32
    return %c0_i32, %arg0 : i32, i32
  }
  func.func @transform_2(%arg0: i32) -> (i32, i32) {
    %c0_i32 = arith.constant 0 : i32
    %c0_i32_0 = arith.constant 0 : i32
    %c0_i32_1 = arith.constant 0 : i32
    return %c0_i32, %c0_i32_0 : i32, i32
  }
  func.func @transform_3(%arg0: i32) -> (i32, i32) {
    %c0_i32 = arith.constant 0 : i32
    %c0_i32_0 = arith.constant 0 : i32
    %c0_i32_1 = arith.constant 0 : i32
    return %c0_i32, %c0_i32_0 : i32, i32
  }
  func.func @transform_4(%arg0: i32) -> (i32, i32) {
    %c0_i32 = arith.constant 0 : i32
    %c0_i32_0 = arith.constant 0 : i32
    %c0_i32_1 = arith.constant 0 : i32
    return %c0_i32, %c0_i32_0 : i32, i32
  }
  func.func @transform_5(%arg0: i32) -> (i32, i32) {
    %c0_i32 = arith.constant 0 : i32
    %c0_i32_0 = arith.constant 0 : i32
    %c0_i32_1 = arith.constant 0 : i32
    return %c0_i32, %c0_i32_0 : i32, i32
  }
  func.func @transform_6(%arg0: i32) -> (i32, i32) {
    %c0_i32 = arith.constant 0 : i32
    %c0_i32_0 = arith.constant 0 : i32
    %c0_i32_1 = arith.constant 0 : i32
    return %c0_i32, %c0_i32_0 : i32, i32
  }
  func.func @transform_7(%arg0: i32) -> (i32, i32) {
    %c0_i32 = arith.constant 0 : i32
    %c0_i32_0 = arith.constant 0 : i32
    %c0_i32_1 = arith.constant 0 : i32
    return %c0_i32, %c0_i32_0 : i32, i32
  }
  func.func @transform_8(%arg0: i32) -> (i32, i32) {
    %c0_i32 = arith.constant 0 : i32
    %c0_i32_0 = arith.constant 0 : i32
    %c0_i32_1 = arith.constant 0 : i32
    return %c0_i32, %c0_i32_0 : i32, i32
  }
  func.func @transform_9(%arg0: i32) -> (i32, i32) {
    %c0_i32 = arith.constant 0 : i32
    %c0_i32_0 = arith.constant 0 : i32
    %c0_i32_1 = arith.constant 0 : i32
    return %c0_i32, %c0_i32_0 : i32, i32
  }
  func.func @transform_10(%arg0: i32) -> (i32, i32) {
    %c0_i32 = arith.constant 0 : i32
    %c0_i32_0 = arith.constant 0 : i32
    %c0_i32_1 = arith.constant 0 : i32
    return %c0_i32, %c0_i32_0 : i32, i32
  }
  func.func @transform_11(%arg0: i32) -> (i32, i32) {
    %c0_i32 = arith.constant 0 : i32
    %c0_i32_0 = arith.constant 0 : i32
    %c0_i32_1 = arith.constant 0 : i32
    return %c0_i32, %c0_i32_0 : i32, i32
  }
  func.func @transform_12(%arg0: i32) -> (i32, i32) {
    %c0_i32 = arith.constant 0 : i32
    %c0_i32_0 = arith.constant 0 : i32
    %c0_i32_1 = arith.constant 0 : i32
    return %c0_i32, %c0_i32_0 : i32, i32
  }
  func.func @transform_13(%arg0: i32) -> (i32, i32) {
    %c0_i32 = arith.constant 0 : i32
    %c0_i32_0 = arith.constant 0 : i32
    %c0_i32_1 = arith.constant 0 : i32
    return %c0_i32, %c0_i32_0 : i32, i32
  }
  func.func @transform_14(%arg0: i32) -> (i32, i32) {
    %c0_i32 = arith.constant 0 : i32
    %c0_i32_0 = arith.constant 0 : i32
    return %c0_i32, %arg0 : i32, i32
  }
  func.func @transform_15(%arg0: i32) -> (i32, i32) {
    %c0_i32 = arith.constant 0 : i32
    %c0_i32_0 = arith.constant 0 : i32
    return %c0_i32, %arg0 : i32, i32
  }
}

</mosaic_0001>

<bundles_post_ra>
// kernel: tpu_custom_call.1
= control target key start
LH: loop header
LB: loop body
LE: loop exit
PB: predicated region body
PF: predicated region fallthrough
CT: control target
= control target key end

     0   :  { %s3709_s0 = inlined_call_operand.hbm [shape: f32[4,1024], index: 0, kind: input, shape index: {}]   ;;  %s3710_s1 = inlined_call_operand.hbm [shape: f32[4,1024], index: 1, kind: input, shape index: {}]   ;;  %s3711_s2 = inlined_call_operand.vmem [shape: f32[4,4], index: 2, kind: input, shape index: {}]   ;;  %s3712_s3 = inlined_call_operand.vmem [shape: f32[4,4], index: 3, kind: input, shape index: {}]   ;;  %s3713_s4 = inlined_call_operand.vmem [shape: f32[4,4], index: 4, kind: input, shape index: {}]   ;;  %s3714_s5 = inlined_call_operand.vmem [shape: f32[4,4], index: 5, kind: input, shape index: {}]   ;;  %s3715_s6 = inlined_call_operand.vmem [shape: f32[4,4], index: 6, kind: input, shape index: {}]   ;;  %s3716_s7 = inlined_call_operand.vmem [shape: f32[4,4], index: 7, kind: input, shape index: {}]   ;;  %s3717_s8 = inlined_call_operand.vmem [shape: f32[4,4], index: 8, kind: input, shape index: {}]   ;;  %s3718_s9 = inlined_call_operand.vmem [shape: f32[4,4], index: 9, kind: input, shape index: {}]   ;;  %s3719_s10 = inlined_call_operand.vmem [shape: f32[4,4], index: 10, kind: input, shape index: {}]   ;;  %s3720_s11 = inlined_call_operand.vmem [shape: f32[4,4], index: 11, kind: input, shape index: {}]   ;;  %s3721_s12 = inlined_call_operand.vmem [shape: f32[4,4], index: 12, kind: input, shape index: {}]   ;;  %s3722_s13 = inlined_call_operand.vmem [shape: f32[4,4], index: 13, kind: input, shape index: {}]   ;;  %s3723_s14 = inlined_call_operand.hbm [shape: f32[4,1024], index: 14, kind: output, shape index: {0}]   ;;  %s3724_s15 = inlined_call_operand.hbm [shape: f32[4,1024], index: 15, kind: output, shape index: {1}]  }
   0x1   :  { %3737 = sst [smem:[#allocation20_spill]] %s3709_s0 }
   0x2   :  { %3738 = sst [smem:[#allocation21_spill]] %s3723_s14 }
   0x3   :  { %3739 = sst [smem:[#allocation22_spill]] %s3724_s15 }
   0x4   :  { %21 = vsyncpa [#allocation3], 0 }
   0x5   :  { %23 = vsyncpa [#allocation3 + $0x1], 0 }
   0x6   :  { %24 = vsyncpa [#allocation6], 0 }
   0x7   :  { %26 = vsyncpa [#allocation6 + $0x1], 0 }
   0x8   :  { %27 = vsyncpa [#allocation4], 0 }
   0x9   :  { %29 = vsyncpa [#allocation4 + $0x1], 0 }
   0xa   :  { %30 = vsyncpa [#allocation9], 0 }
   0xb   :  { %32 = vsyncpa [#allocation9 + $0x1], 0  ;;  %s3283_s18 = smov 0   ;;  %s3285_s19 = smov 0  }
   0xc   :  { %s3287_s20 = smov 0   ;;  %s3289_s21 = smov 0  }
   0xd LB: > { %3740 = sst [smem:[#allocation14_spill]] %s3184_s18  ;;  %s3304_s22 = sadd.s32 4294967295, %s3196_s21   ;;  %s3196_s21 = sphi %s3289_s21, %s3767_s21   ;;  %s3192_s20 = sphi %s3287_s20, %s3769_s20   ;;  %s3188_s19 = sphi %s3285_s19, %s3771_s19   ;;  %s3184_s18 = sphi %s3283_s18, %s3770_s18  }
   0xe   : > { %3741 = sst [smem:[#allocation15_spill]] %s3192_s20  ;;  %s2821_s23 = sadd.s32 4294967294, %s3196_s21  }
   0xf   : > { %3742 = sst [smem:[#allocation16_spill]] %s3196_s21  ;;  %s3308_s24 = sadd.s32 1, %s3196_s21  }
  0x10   : > { %3743 = sst [smem:[#allocation17_spill]] %s3308_s24  ;;  %s45_s25 = sadd.s32 1, %s3192_s20 }
  0x11   : > { %s42_s26 = ssub.s32 %s3196_s21, %s3308_s24  ;;  %p52_p0 = scmp.ne.s32.totalorder %s3192_s20, %s3188_s19 }
  0x12   : > { %p43_p1 = scmp.eq.s32.totalorder %s42_s26, 0  ;;  %p53_p2 = scmp.eq.s32.totalorder %s3196_s21, 0 }
  0x13   : > { %p58_p3 = scmp.ne.s32.totalorder %s3188_s19, %s3184_s18  ;;  %p59_p4 = scmp.eq.s32.totalorder %s3304_s22, 0 }
  0x14   : > { %s3320_s27 = scalar_select %p43_p1, %s3192_s20, %s45_s25  }
  0x15   : > { %p3322_p5 = por %p53_p2, %p52_p0  ;;  %p3326_p6 = por %p59_p4, %p58_p3 }
  0x16   : > { %3744 = sst [smem:[#allocation18_spill]] %s3320_s27  ;;  %p360_p7 = scmp.eq.s32.totalorder %s3304_s22, 1 }
  0x17   : > { %s3746_s29 = scalar_select %p3326_p6, 1, 0 }
  0x18   : > { %p366_p8 = scmp.eq.s32.totalorder %s2821_s23, 1  ;;  %p2949_p10 = scmp.lt.s32.totalorder %s3196_s21, 2 }
  0x19   : > { %p3333_p11 = por %p360_p7, %p52_p0  ;;  %s3342_s17 = sand.u32 1, %s3192_s20  }
  0x1a   : > { %p3337_p12 = por %p366_p8, %p58_p3  ;;  %s3731_s25 = sshll.u32 %s3196_s21, 8 }
  0x1b   : > { %s3747_s30 = scalar_select %p3333_p11, 1, 0 }
  0x1c   : > { %s3748_s16 = scalar_select %p3337_p12, 1, 0 }
  0x1d   : > { %s3730_s26 = sshll.u32 %s3342_s17, 4  ;;  %s3750_s0 = sld [smem:[#allocation20_spill]] }
  0x1e   : > { %3749 = sst [smem:[#allocation19_spill]] %s3748_s16  ;;  %s452_s18 = scalar_lea.vmem [#allocation2], %s3730_s26 }
  0x1f   : > { %s460_s16 = sshll.u32 %s452_s18, 4  ;;  %p3357_p13 = pnand %p2949_p10, %p3322_p5  ;;  %s3361_s16 = int_to_ptr.vmem [resolvable:$true] %s460_s16 }
  0x20   : > { %s449_s27 = scalar_lea.sflag [#allocation3], %s3342_s17 }
  0x21   : > { %p3036_p3 = pneg %p3357_p13 }
  0x23   : > { %s3351_s24 = scalar_lea.hbm %s3750_s0, %s3731_s25  ;;  %s3039_s26 = scalar_lea.hbm %s3750_s0, 512 }
  0x24   : > { %s3034_s23 = scalar_lea.hbm %s3351_s24, 256  ;;  %p3040_p5 = scmp.lt.u32.totalorder %s3351_s24, %s3750_s0 }
  0x25   : > { %p3035_p2 = scmp.ne.s32.totalorder %s3351_s24, %s3034_s23  ;;  %p3041_p8 = scmp.lt.u32.totalorder %s3039_s26, %s3034_s23 }
  0x26   : > { %p3043_p9 = scmp.lt.u32.totalorder %s3034_s23, %s3351_s24 }
  0x27   : > { %p3037_p4 = pnand %p3036_p3, %p3035_p2  ;;  %p3042_p10 = por %p3041_p8, %p3040_p5 }
  0x29   : > { %p3038_p7 = pneg %p3037_p4  ;;  %p3044_p0 = por %p3043_p9, %p3042_p10 }
  0x2b   : > { %p3045_p1 = pnand %p3044_p0, %p3038_p7 }
  0x2d   : > { %3048 = shalt.err (!%p3045_p1)
}
  0x2e   : > { %s3049_s14 = scalar_lea.vmem %s3361_s16, 256  ;;  %s3198_s18 = smov [#allocation2]  }
  0x2f   : > { %p3050_p2 = scmp.ne.s32.totalorder %s3361_s16, %s3049_s14  ;;  %s3054_s28 = sshll.u32 %s3198_s18, 4  ;;  %s3055_s28 = int_to_ptr.vmem [resolvable:$false] %s3054_s28 }
  0x30   : > { %s3056_s15 = scalar_lea.vmem %s3055_s28, 512  ;;  %p3057_p11 = scmp.lt.s32.totalorder %s3361_s16, %s3055_s28 }
  0x31   : > { %p3052_p4 = pnand %p3050_p2, %p3036_p3  ;;  %p3058_p5 = scmp.lt.s32.totalorder %s3056_s15, %s3049_s14 }
  0x33   : > { %p3053_p12 = pneg %p3052_p4  ;;  %p3059_p8 = por %p3058_p5, %p3057_p11 }
  0x35   : > { %p3060_p9 = pnand %p3059_p8, %p3053_p12 }
  0x37   : > { %3063 = shalt.err (!%p3060_p9)
}
  0x38   : > { %2938 = dma.hbm_to_vmem [thread:$0]  (!%p3357_p13), %s3351_s24, 256, %s3361_s16, %s449_s27  }
  0x39   : > { %p3752_p0 = scmp.lt.s32.totalorder %s3196_s21, 3  ;;  %p3753_p1 = scmp.ge.s32.totalorder %s3196_s21, 1 }
  0x3a   : > { %s3755_s14 = sshll.u32 %s3196_s21, 8  ;;  %s3756_s28 = sshll.u32 %s3342_s17, 4 }
  0x3b   : > { %p3395_p7 = pnand %p3753_p1, %p3752_p0  ;;  %s3404_s18 = scalar_lea.hbm %s3710_s1, %s3755_s14 }
  0x3c   : > { %s471_s15 = scalar_lea.vmem [#allocation5], %s3756_s28  ;;  %s468_s24 = scalar_lea.sflag [#allocation6], %s3342_s17 }
  0x3d   : > { %s3754_s25 = scalar_select %p3395_p7, 1, 0 }
  0x3e   : > { %s479_s0 = sshll.u32 %s471_s15, 4  ;;  %s3064_s16 = scalar_lea.hbm %s3404_s18, 256  ;;  %s480_s0 = int_to_ptr.vmem [resolvable:$true] %s479_s0 }
  0x3f   : > { %p3065_p11 = scmp.ne.s32.totalorder %s3404_s18, %s3064_s16  ;;  %s3069_s14 = scalar_lea.hbm %s3710_s1, 512 }
  0x40   : > { %p3070_p2 = scmp.lt.u32.totalorder %s3404_s18, %s3710_s1  ;;  %p3071_p4 = scmp.lt.u32.totalorder %s3069_s14, %s3064_s16 }
  0x41   : > { %p3067_p12 = pnand %p3065_p11, %p3036_p3  ;;  %p3073_p8 = scmp.lt.u32.totalorder %s3064_s16, %s3404_s18 }
  0x42   : > { %p3072_p5 = por %p3071_p4, %p3070_p2 }
  0x43   : > { %p3068_p10 = pneg %p3067_p12 }
  0x44   : > { %p3074_p9 = por %p3073_p8, %p3072_p5 }
  0x46   : > { %p3075_p0 = pnand %p3074_p9, %p3068_p10 }
  0x48   : > { %3078 = shalt.err (!%p3075_p0)
}
  0x49   : > { %s3079_s17 = scalar_lea.vmem %s480_s0, 256  ;;  %s3199_s28 = smov [#allocation5]  }
  0x4a   : > { %p3080_p1 = scmp.ne.s32.totalorder %s480_s0, %s3079_s17  ;;  %s3084_s21 = sshll.u32 %s3199_s28, 4  ;;  %s3085_s21 = int_to_ptr.vmem [resolvable:$false] %s3084_s21 }
  0x4b   : > { %s3086_s15 = scalar_lea.vmem %s3085_s21, 512  ;;  %p3087_p6 = scmp.lt.s32.totalorder %s480_s0, %s3085_s21 }
  0x4c   : > { %p3082_p11 = pnand %p3080_p1, %p3036_p3  ;;  %p3088_p7 = scmp.lt.s32.totalorder %s3086_s15, %s3079_s17 }
  0x4e   : > { %p3083_p12 = pneg %p3082_p11  ;;  %p3089_p2 = por %p3088_p7, %p3087_p6 }
  0x50   : > { %p3090_p4 = pnand %p3089_p2, %p3083_p12 }
  0x52   : > { %3093 = shalt.err (!%p3090_p4)
}
  0x53   : > { %2941 = dma.hbm_to_vmem [thread:$0]  (!%p3357_p13), %s3404_s18, 256, %s480_s0, %s468_s24  }
  0x54   : > { %p3757_p10 = scmp.ne.s32.totalorder %s3754_s25, 0 }
  0x55   : > { %s3431_s16 = sand.u32 (!%p3757_p10), 1, %s3188_s19   ;;  %p3758_p6 = scmp.ne.s32.totalorder (!%p3757_p10), %s3746_s29, 0 }
  0x56   : > { %488 = sbr.rel (%p3757_p10) target bundleno = 2308 (0x904), region = 76  ;;  %s3434_s27 = sshll.u32 (!%p3757_p10), %s3431_s16, 4 }
  0x57   : > { %s491_s14 = scalar_lea.sflag (!%p3757_p10), [#allocation3], %s3431_s16  ;;  %s494_s26 = scalar_lea.vmem (!%p3757_p10), [#allocation2], %s3434_s27 }
  0x5d   : > { %3167 = dma.done.wait (%p3758_p6), %s491_s14, 256  }
  0x5e   : > { %3169 = vsyncadd (%p3758_p6), %s491_s14, 4294967040  ;;  %s500_s0 = scalar_lea.sflag [#allocation6], %s3431_s16  ;;  %s503_s20 = scalar_lea.vmem [#allocation5], %s3434_s27 }
  0x5f   : > { %3171 = dma.done.wait (%p3758_p6), %s500_s0, 256  }
  0x60   : > { %3173 = vsyncadd (%p3758_p6), %s500_s0, 4294967040  ;;  %v3200_v0 = vmov 0.0   ;;  %v3450_v1 = vld [vmem:[%s503_s20] sm:$0xff]  ;;  %vm577_vm0 = vcmask 1043456   ;;  %v3452_v2 = vld [vmem:[%s503_s20 + $0x8] sm:$0xff]  ;;  %vm573_vm1 = vcmask 31744  }
  0x61   : > { %650 = vmatprep.mubr.f32.mxu0 %v3200_v0  ;;  %721 = vmatprep.mubr.f32.mxu1 %v3200_v0  ;;  %v571_v3 = vcombine.high %v3450_v1, %v3450_v1  ;;  %v572_v4 = vcombine.high %v3452_v2, %v3452_v2  ;;  %v568_v5 = vld [vmem:[%s3714_s5] sm:$0xf]  ;;  %s3539_s25 = scalar_lea.vmem [#allocation7], %s3434_s27  ;;  %s3759_s23 = sld [smem:[#allocation21_spill]] }
  0x62   : > { %v740_v15 = vld [vmem:[%s3715_s6] sm:$0xf]  ;;  %s2682_s18 = sshll.u32 %s3539_s25, 4  ;;  %s2663_s28 = scalar_lea.sflag [#allocation4], %s3431_s16  ;;  %s2683_s18 = int_to_ptr.vmem [resolvable:$true] %s2682_s18 }
  0x63   : > { %2835 = vmatprep.subr.msk.mxu0 %vm577_vm0, %v571_v3  ;;  %2838 = vmatprep.subr.msk.mxu1 %vm577_vm0, %v572_v4  ;;  %v910_v28 = vld [vmem:[%s3716_s7] sm:$0xf]  ;;  %s3094_s21 = scalar_lea.vmem %s2683_s18, 256  ;;  %p3760_p3 = scmp.ne.s32.totalorder %s3747_s30, 0 }
  0x64   : > { %2836 = vmatpush1.msk.msra.mxu0 %vm577_vm0, %v3450_v1  ;;  %2839 = vmatpush1.msk.msra.mxu1 %vm577_vm0, %v3452_v2  ;;  %v1118_v32 = vld [vmem:[%s3720_s11] sm:$0xf]  ;;  %p3095_p13 = scmp.ne.s32.totalorder %s2683_s18, %s3094_s21  ;;  %s3201_s15 = smov [#allocation7]  }
  0x65   : > { %2837 = vmatmul.mubr.msk.f32.vlgmr.msra.gmra.mrb[0].mxu0 %vm573_vm1, %v568_v5  ;;  %2840 = vmatmul.mubr.msk.f32.vlgmr.msra.gmra.mrb[0].mxu1 %vm573_vm1, %v568_v5  ;;  %v1276_v54 = vld [vmem:[%s3721_s12] sm:$0xf]  ;;  %s3098_s14 = sshll.u32 %s3201_s15, 4  ;;  %s3099_s14 = int_to_ptr.vmem [resolvable:$false] %s3098_s14 }
  0x66   : > { %820 = vmatprep.mubr.f32.mxu0 %v3200_v0  ;;  %891 = vmatprep.mubr.f32.mxu1 %v3200_v0  ;;  %p3096_p7 = pnand %p3095_p13, %p3760_p3  ;;  %s3100_s0 = scalar_lea.vmem %s3099_s14, 512 }
  0x67   : > { %p3101_p8 = scmp.lt.s32.totalorder %s2683_s18, %s3099_s14  ;;  %p3102_p9 = scmp.lt.s32.totalorder %s3100_s0, %s3094_s21 }
  0x68   : > { %p3097_p5 = pneg %p3096_p7 }
  0x69   : > { %p3103_p0 = por %p3102_p9, %p3101_p8 }
  0x6b   : > { %p3104_p1 = pnand %p3103_p0, %p3097_p5 }
 0x138   : > { %v652_v6 = vpop.f32.mrb[0].mxu0  ;;  %v723_v7 = vpop.f32.mrb[0].mxu1 }
 0x139   : > { %v732_v8 = vmul.f32 0.2, %v652_v6  ;;  %v654_v9 = vpop.f32.mrb[1].mxu0  ;;  %v725_v10 = vpop.f32.mrb[1].mxu1  ;;  %vm728_vm2 = vcmp.gt.f32.partialorder %v652_v6, 0.0  ;;  %vm730_vm4 = vcmp.gt.f32.partialorder %v723_v7, 0.0 }
 0x13a   : > { %v734_v11 = vmul.f32 0.2, %v723_v7  ;;  %vm729_vm3 = vcmp.gt.f32.partialorder %v654_v9, 0.0  ;;  %v733_v12 = vmul.f32 0.2, %v654_v9  ;;  %vm731_vm5 = vcmp.gt.f32.partialorder %v725_v10, 0.0 }
 0x13b   : > { %v735_v13 = vmul.f32 0.2, %v725_v10  ;;  %v736_v16 = vsel %vm728_vm2, %v652_v6, %v732_v8 }
 0x13c   : > { %v737_v14 = vsel %vm729_vm3, %v654_v9, %v733_v12  ;;  %v738_v18 = vsel %vm730_vm4, %v723_v7, %v734_v11 }
 0x13d   : > { %2841 = vmatprep.subr.msk.mxu0 %vm577_vm0, %v737_v14  ;;  %v739_v17 = vsel %vm731_vm5, %v725_v10, %v735_v13 }
 0x13e   : > { %2844 = vmatprep.subr.msk.mxu1 %vm577_vm0, %v739_v17  ;;  %2842 = vmatpush1.msk.msra.mxu0 %vm577_vm0, %v736_v16 }
 0x13f   : > { %2845 = vmatpush1.msk.msra.mxu1 %vm577_vm0, %v738_v18  ;;  %2843 = vmatmul.mubr.msk.f32.vlgmr.msra.gmra.mrb[2].mxu0 %vm573_vm1, %v740_v15 }
 0x140   : > { %2846 = vmatmul.mubr.msk.f32.vlgmr.msra.gmra.mrb[2].mxu1 %vm573_vm1, %v740_v15  ;;  %990 = vmatprep.mubr.f32.mxu0 %v3200_v0 }
 0x141   : > { %1061 = vmatprep.mubr.f32.mxu1 %v3200_v0 }
 0x212   : > { %v822_v19 = vpop.f32.mrb[2].mxu0 }
 0x213   : > { %v902_v20 = vmul.f32 0.2, %v822_v19  ;;  %v893_v21 = vpop.f32.mrb[2].mxu1  ;;  %v824_v22 = vpop.f32.mrb[3].mxu0  ;;  %vm898_vm6 = vcmp.gt.f32.partialorder %v822_v19, 0.0 }
 0x214   : > { %vm899_vm7 = vcmp.gt.f32.partialorder %v824_v22, 0.0  ;;  %v903_v23 = vmul.f32 0.2, %v824_v22  ;;  %v904_v24 = vmul.f32 0.2, %v893_v21  ;;  %v895_v25 = vpop.f32.mrb[3].mxu1 }
 0x215   : > { %vm900_vm8 = vcmp.gt.f32.partialorder %v893_v21, 0.0  ;;  %vm901_vm9 = vcmp.gt.f32.partialorder %v895_v25, 0.0  ;;  %v905_v26 = vmul.f32 0.2, %v895_v25  ;;  %v906_v29 = vsel %vm898_vm6, %v822_v19, %v902_v20 }
 0x216   : > { %v907_v27 = vsel %vm899_vm7, %v824_v22, %v903_v23  ;;  %v908_v31 = vsel %vm900_vm8, %v893_v21, %v904_v24 }
 0x217   : > { %2847 = vmatprep.subr.msk.mxu0 %vm577_vm0, %v907_v27  ;;  %v909_v30 = vsel %vm901_vm9, %v895_v25, %v905_v26 }
 0x218   : > { %2848 = vmatpush1.msk.msra.mxu0 %vm577_vm0, %v906_v29  ;;  %2850 = vmatprep.subr.msk.mxu1 %vm577_vm0, %v909_v30 }
 0x219   : > { %2849 = vmatmul.mubr.msk.f32.vlgmr.msra.gmra.mrb[4].mxu0 %vm573_vm1, %v910_v28  ;;  %2851 = vmatpush1.msk.msra.mxu1 %vm577_vm0, %v908_v31 }
 0x21a   : > { %2857 = vmatprep.subr.msk.mxu0 %vm577_vm0, %v571_v3  ;;  %2852 = vmatmul.mubr.msk.f32.vlgmr.msra.gmra.mrb[4].mxu1 %vm573_vm1, %v910_v28 }
 0x21b   : > { %2860 = vmatprep.subr.msk.mxu1 %vm577_vm0, %v572_v4  ;;  %2858 = vmatpush1.msk.msra.mxu0 %vm577_vm0, %v3450_v1 }
 0x21c   : > { %1186 = vmatprep.mubr.f32.mxu0 %v3200_v0  ;;  %2861 = vmatpush1.msk.msra.mxu1 %vm577_vm0, %v3452_v2 }
 0x21d   : > { %1257 = vmatprep.mubr.f32.mxu1 %v3200_v0  ;;  %2859 = vmatmul.mubr.msk.f32.vlgmr.msra.gmra.mrb[6].mxu0 %vm573_vm1, %v1118_v32 }
 0x21e   : > { %2862 = vmatmul.mubr.msk.f32.vlgmr.msra.gmra.mrb[6].mxu1 %vm573_vm1, %v1118_v32  ;;  %1356 = vmatprep.mubr.f32.mxu0 %v3200_v0 }
 0x21f   : > { %1427 = vmatprep.mubr.f32.mxu1 %v3200_v0 }
 0x2ec   : > { %v992_v33 = vpop.f32.mrb[4].mxu0 }
 0x2ed   : > { %v1068_v34 = vsub.f32 0.0, %v992_v33  ;;  %v994_v35 = vpop.f32.mrb[5].mxu0  ;;  %v1063_v36 = vpop.f32.mrb[4].mxu1 }
 0x2ee   : > { %v1069_v37 = vsub.f32 0.0, %v994_v35  ;;  %v1070_v39 = vsub.f32 0.0, %v1063_v36  ;;  %v1065_v40 = vpop.f32.mrb[5].mxu1  ;;  %v1446_v36 = vld [vmem:[%s3722_s13] sm:$0xf] }
 0x2ef   : > { %v1072_v38 = vmul.f32 1.442695, %v1068_v34  ;;  %v1071_v42 = vsub.f32 0.0, %v1065_v40  ;;  %v564_v40 = vld [vmem:[%s494_s26] sm:$0xff] }
 0x2f0   : > { %v1074_v41 = vmul.f32 1.442695, %v1069_v37  ;;  %v1076_v43 = vmul.f32 1.442695, %v1070_v39  ;;  %v1188_v44 = vpop.f32.mrb[6].mxu0 }
 0x2f1   : > { %2986 = vpow2.f32 %v1072_v38  ;;  %v1078_v45 = vmul.f32 1.442695, %v1071_v42  ;;  %v1259_v46 = vpop.f32.mrb[6].mxu1  ;;  %vm1264_vm10 = vcmp.gt.f32.partialorder %v1188_v44, 0.0  ;;  %v1268_v47 = vmul.f32 0.2, %v1188_v44 }
 0x2f2   : > { %2988 = vpow2.f32 %v1074_v41  ;;  %v1190_v48 = vpop.f32.mrb[7].mxu0  ;;  %v1261_v49 = vpop.f32.mrb[7].mxu1  ;;  %v1270_v50 = vmul.f32 0.2, %v1259_v46  ;;  %vm1266_vm12 = vcmp.gt.f32.partialorder %v1259_v46, 0.0 }
 0x2f3   : > { %2990 = vpow2.f32 %v1076_v43  ;;  %vm1265_vm11 = vcmp.gt.f32.partialorder %v1190_v48, 0.0  ;;  %v1269_v51 = vmul.f32 0.2, %v1190_v48  ;;  %vm1267_vm13 = vcmp.gt.f32.partialorder %v1261_v49, 0.0  ;;  %v565_v43 = vld [vmem:[%s494_s26 + $0x8] sm:$0xff]  ;;  %s2925_s26 = sshll.u32 %s3304_s22, 8 }
 0x2f4   : > { %2992 = vpow2.f32 %v1078_v45  ;;  %v1271_v52 = vmul.f32 0.2, %v1261_v49  ;;  %v1272_v55 = vsel %vm1264_vm10, %v1188_v44, %v1268_v47  ;;  %v1274_v57 = vsel %vm1266_vm12, %v1259_v46, %v1270_v50  ;;  %s3634_s17 = scalar_lea.hbm %s3759_s23, %s2925_s26 }
 0x2f5   : > { %v1273_v53 = vsel %vm1265_vm11, %v1190_v48, %v1269_v51 }
 0x2f6   : > { %2863 = vmatprep.subr.msk.mxu0 %vm577_vm0, %v1273_v53  ;;  %v1275_v56 = vsel %vm1267_vm13, %v1261_v49, %v1271_v52  ;;  %v1614_v53 = vld [vmem:[%s3711_s2] sm:$0xf] }
 0x2f7   : > { %2866 = vmatprep.subr.msk.mxu1 %vm577_vm0, %v1275_v56  ;;  %2864 = vmatpush1.msk.msra.mxu0 %vm577_vm0, %v1272_v55 }
 0x2f8   : > { %2867 = vmatpush1.msk.msra.mxu1 %vm577_vm0, %v1274_v57  ;;  %2865 = vmatmul.mubr.msk.f32.vlgmr.msra.gmra.mrb[8].mxu0 %vm573_vm1, %v1276_v54 }
 0x2f9   : > { %2868 = vmatmul.mubr.msk.f32.vlgmr.msra.gmra.mrb[8].mxu1 %vm573_vm1, %v1276_v54  ;;  %1526 = vmatprep.mubr.f32.mxu0 %v3200_v0 }
 0x2fa   : > { %1597 = vmatprep.mubr.f32.mxu1 %v3200_v0 }
 0x2fb   : > { %v2987_v58 = vpop.eup %2986 }
 0x2fc   : > { %v2989_v59 = vpop.eup %2988  ;;  %v1080_v60 = vadd.f32 1.0, %v2987_v58 }
 0x2fd   : > { %v2991_v61 = vpop.eup %2990  ;;  %v1081_v62 = vadd.f32 1.0, %v2989_v59 }
 0x2fe   : > { %v2993_v63 = vpop.eup %2992  ;;  %2994 = vrcp.f32 %v1080_v60  ;;  %v1082_v3 = vadd.f32 1.0, %v2991_v61 }
 0x2ff   : > { %2996 = vrcp.f32 %v1081_v62  ;;  %v1083_v4 = vadd.f32 1.0, %v2993_v63 }
 0x300   : > { %2998 = vrcp.f32 %v1082_v3  ;;  %v1784_v3 = vld [vmem:[%s3712_s3] sm:$0xf] }
 0x301   : > { %3000 = vrcp.f32 %v1083_v4 }
 0x308   : > { %v2995_v5 = vpop.eup %2994 }
 0x309   : > { %v2997_v6 = vpop.eup %2996  ;;  %v1092_v7 = vmul.f32 2.0, %v2995_v5 }
 0x30a   : > { %v2999_v8 = vpop.eup %2998  ;;  %v1093_v9 = vmul.f32 2.0, %v2997_v6 }
 0x30b   : > { %v3001_v10 = vpop.eup %3000  ;;  %v2853_v11 = vadd.f32 -1.0, %v1092_v7  ;;  %v1094_v12 = vmul.f32 2.0, %v2999_v8 }
 0x30c   : > { %v2854_v13 = vadd.f32 -1.0, %v1093_v9  ;;  %v1095_v14 = vmul.f32 2.0, %v3001_v10 }
 0x30d   : > { %v1100_v15 = vmul.f32 1.442695, %v2853_v11  ;;  %v2855_v16 = vadd.f32 -1.0, %v1094_v12 }
 0x30e   : > { %v1102_v17 = vmul.f32 1.442695, %v2854_v13  ;;  %v2856_v18 = vadd.f32 -1.0, %v1095_v14 }
 0x30f   : > { %3002 = vpow2.f32 %v1100_v15  ;;  %v1104_v19 = vmul.f32 1.442695, %v2855_v16  ;;  %v1954_v16 = vld [vmem:[%s3713_s4] sm:$0xf] }
 0x310   : > { %3004 = vpow2.f32 %v1102_v17  ;;  %v1106_v20 = vmul.f32 1.442695, %v2856_v18 }
 0x311   : > { %3006 = vpow2.f32 %v1104_v19 }
 0x312   : > { %3008 = vpow2.f32 %v1106_v20  ;;  %v2162_v20 = vld [vmem:[%s3717_s8] sm:$0xf] }
 0x319   : > { %v3003_v21 = vpop.eup %3002 }
 0x31a   : > { %v3005_v22 = vpop.eup %3004 }
 0x31b   : > { %v3007_v23 = vpop.eup %3006  ;;  %v1112_v24 = vcombine.low %v3003_v21, %v3005_v22 }
 0x31c   : > { %v3009_v25 = vpop.eup %3008 }
 0x31d   : > { %v1113_v26 = vcombine.low %v3007_v23, %v3009_v25  ;;  %v1116_v45 = vmul.f32 %v1112_v24, %v564_v40 }
 0x31f   : > { %v1117_v49 = vmul.f32 %v1113_v26, %v565_v43 }
 0x3cb   : > { %v1358_v27 = vpop.f32.mrb[8].mxu0 }
 0x3cc   : > { %v1438_v28 = vmul.f32 0.2, %v1358_v27  ;;  %v1429_v29 = vpop.f32.mrb[8].mxu1  ;;  %v1360_v30 = vpop.f32.mrb[9].mxu0  ;;  %vm1434_vm14 = vcmp.gt.f32.partialorder %v1358_v27, 0.0 }
 0x3cd   : > { %vm1435_vm15 = vcmp.gt.f32.partialorder %v1360_v30, 0.0  ;;  %v1439_v31 = vmul.f32 0.2, %v1360_v30  ;;  %v1440_v32 = vmul.f32 0.2, %v1429_v29  ;;  %v1431_v33 = vpop.f32.mrb[9].mxu1 }
 0x3ce   : > { %vm1436_vm2 = vcmp.gt.f32.partialorder %v1429_v29, 0.0  ;;  %vm1437_vm3 = vcmp.gt.f32.partialorder %v1431_v33, 0.0  ;;  %v1441_v34 = vmul.f32 0.2, %v1431_v33  ;;  %v1442_v37 = vsel %vm1434_vm14, %v1358_v27, %v1438_v28 }
 0x3cf   : > { %v1443_v35 = vsel %vm1435_vm15, %v1360_v30, %v1439_v31  ;;  %v1444_v39 = vsel %vm1436_vm2, %v1429_v29, %v1440_v32 }
 0x3d0   : > { %2869 = vmatprep.subr.msk.mxu0 %vm577_vm0, %v1443_v35  ;;  %v1445_v38 = vsel %vm1437_vm3, %v1431_v33, %v1441_v34 }
 0x3d1   : > { %2870 = vmatpush1.msk.msra.mxu0 %vm577_vm0, %v1442_v37  ;;  %2872 = vmatprep.subr.msk.mxu1 %vm577_vm0, %v1445_v38 }
 0x3d2   : > { %2871 = vmatmul.mubr.msk.f32.vlgmr.msra.gmra.mrb[10].mxu0 %vm573_vm1, %v1446_v36  ;;  %2873 = vmatpush1.msk.msra.mxu1 %vm577_vm0, %v1444_v39 }
 0x3d3   : > { %1694 = vmatprep.mubr.f32.mxu0 %v3200_v0  ;;  %2874 = vmatmul.mubr.msk.f32.vlgmr.msra.gmra.mrb[10].mxu1 %vm573_vm1, %v1446_v36 }
 0x3d4   : > { %1765 = vmatprep.mubr.f32.mxu1 %v3200_v0 }
 0x4a5   : > { %v1528_v41 = vpop.f32.mrb[10].mxu0 }
 0x4a6   : > { %v1530_v42 = vpop.f32.mrb[11].mxu0  ;;  %v1599_v44 = vpop.f32.mrb[10].mxu1 }
 0x4a7   : > { %v1608_v46 = vcombine.low %v1528_v41, %v1530_v42  ;;  %v1601_v47 = vpop.f32.mrb[11].mxu1  ;;  %v2320_v42 = vld [vmem:[%s3718_s9] sm:$0xf] }
 0x4a8   : > { %v1609_v50 = vcombine.low %v1599_v44, %v1601_v47 }
 0x4a9   : > { %v3532_v48 = vadd.f32 %v1608_v46, %v1116_v45 }
 0x4aa   : > { %v3534_v51 = vadd.f32 %v1609_v50, %v1117_v49 }
 0x4ab   : > { %v1617_v52 = vcombine.high %v3532_v48, %v3532_v48  ;;  %2658 = vst [vmem:[%s3539_s25] sm:$0xff] %v3532_v48 }
 0x4ac   : > { %v1618_v54 = vcombine.high %v3534_v51, %v3534_v51  ;;  %2659 = vst [vmem:[%s3539_s25 + $0x8] sm:$0xff] %v3534_v51 }
 0x4ad   : > { %2875 = vmatprep.subr.msk.mxu0 %vm577_vm0, %v1617_v52 }
 0x4ae   : > { %2876 = vmatpush1.msk.msra.mxu0 %vm577_vm0, %v3532_v48  ;;  %2878 = vmatprep.subr.msk.mxu1 %vm577_vm0, %v1618_v54 }
 0x4af   : > { %2877 = vmatmul.mubr.msk.f32.vlgmr.msra.gmra.mrb[12].mxu0 %vm573_vm1, %v1614_v53  ;;  %2879 = vmatpush1.msk.msra.mxu1 %vm577_vm0, %v3534_v51 }
 0x4b0   : > { %1864 = vmatprep.mubr.f32.mxu0 %v3200_v0  ;;  %2880 = vmatmul.mubr.msk.f32.vlgmr.msra.gmra.mrb[12].mxu1 %vm573_vm1, %v1614_v53 }
 0x4b1   : > { %1935 = vmatprep.mubr.f32.mxu1 %v3200_v0 }
 0x582   : > { %v1696_v55 = vpop.f32.mrb[12].mxu0 }
 0x583   : > { %v1776_v56 = vmul.f32 0.2, %v1696_v55  ;;  %v1698_v57 = vpop.f32.mrb[13].mxu0  ;;  %vm1772_vm4 = vcmp.gt.f32.partialorder %v1696_v55, 0.0  ;;  %v1767_v58 = vpop.f32.mrb[12].mxu1 }
 0x584   : > { %vm1773_vm5 = vcmp.gt.f32.partialorder %v1698_v57, 0.0  ;;  %v1777_v59 = vmul.f32 0.2, %v1698_v57  ;;  %v1778_v60 = vmul.f32 0.2, %v1767_v58  ;;  %v1769_v61 = vpop.f32.mrb[13].mxu1 }
 0x585   : > { %vm1774_vm6 = vcmp.gt.f32.partialorder %v1767_v58, 0.0  ;;  %vm1775_vm7 = vcmp.gt.f32.partialorder %v1769_v61, 0.0  ;;  %v1779_v62 = vmul.f32 0.2, %v1769_v61  ;;  %v1780_v4 = vsel %vm1772_vm4, %v1696_v55, %v1776_v56 }
 0x586   : > { %v1781_v63 = vsel %vm1773_vm5, %v1698_v57, %v1777_v59  ;;  %v1782_v6 = vsel %vm1774_vm6, %v1767_v58, %v1778_v60 }
 0x587   : > { %2881 = vmatprep.subr.msk.mxu0 %vm577_vm0, %v1781_v63  ;;  %v1783_v5 = vsel %vm1775_vm7, %v1769_v61, %v1779_v62 }
 0x588   : > { %2882 = vmatpush1.msk.msra.mxu0 %vm577_vm0, %v1780_v4  ;;  %2884 = vmatprep.subr.msk.mxu1 %vm577_vm0, %v1783_v5 }
 0x589   : > { %2883 = vmatmul.mubr.msk.f32.vlgmr.msra.gmra.mrb[14].mxu0 %vm573_vm1, %v1784_v3  ;;  %2885 = vmatpush1.msk.msra.mxu1 %vm577_vm0, %v1782_v6 }
 0x58a   : > { %2034 = vmatprep.mubr.f32.mxu0 %v3200_v0  ;;  %2886 = vmatmul.mubr.msk.f32.vlgmr.msra.gmra.mrb[14].mxu1 %vm573_vm1, %v1784_v3 }
 0x58b   : > { %2105 = vmatprep.mubr.f32.mxu1 %v3200_v0 }
 0x65c   : > { %v1866_v7 = vpop.f32.mrb[14].mxu0 }
 0x65d   : > { %v1946_v8 = vmul.f32 0.2, %v1866_v7  ;;  %v1868_v9 = vpop.f32.mrb[15].mxu0  ;;  %vm1942_vm8 = vcmp.gt.f32.partialorder %v1866_v7, 0.0  ;;  %v1937_v10 = vpop.f32.mrb[14].mxu1 }
 0x65e   : > { %vm1943_vm9 = vcmp.gt.f32.partialorder %v1868_v9, 0.0  ;;  %v1947_v11 = vmul.f32 0.2, %v1868_v9  ;;  %v1948_v12 = vmul.f32 0.2, %v1937_v10  ;;  %v1939_v13 = vpop.f32.mrb[15].mxu1 }
 0x65f   : > { %vm1944_vm10 = vcmp.gt.f32.partialorder %v1937_v10, 0.0  ;;  %vm1945_vm11 = vcmp.gt.f32.partialorder %v1939_v13, 0.0  ;;  %v1949_v14 = vmul.f32 0.2, %v1939_v13  ;;  %v1950_v17 = vsel %vm1942_vm8, %v1866_v7, %v1946_v8 }
 0x660   : > { %v1951_v15 = vsel %vm1943_vm9, %v1868_v9, %v1947_v11  ;;  %v1952_v19 = vsel %vm1944_vm10, %v1937_v10, %v1948_v12 }
 0x661   : > { %2887 = vmatprep.subr.msk.mxu0 %vm577_vm0, %v1951_v15  ;;  %v1953_v18 = vsel %vm1945_vm11, %v1939_v13, %v1949_v14 }
 0x662   : > { %2888 = vmatpush1.msk.msra.mxu0 %vm577_vm0, %v1950_v17  ;;  %2890 = vmatprep.subr.msk.mxu1 %vm577_vm0, %v1953_v18 }
 0x663   : > { %2889 = vmatmul.mubr.msk.f32.vlgmr.msra.gmra.mrb[16].mxu0 %vm573_vm1, %v1954_v16  ;;  %2891 = vmatpush1.msk.msra.mxu1 %vm577_vm0, %v1952_v19 }
 0x664   : > { %2897 = vmatprep.subr.msk.mxu0 %vm577_vm0, %v1617_v52  ;;  %2892 = vmatmul.mubr.msk.f32.vlgmr.msra.gmra.mrb[16].mxu1 %vm573_vm1, %v1954_v16 }
 0x665   : > { %2900 = vmatprep.subr.msk.mxu1 %vm577_vm0, %v1618_v54  ;;  %2898 = vmatpush1.msk.msra.mxu0 %vm577_vm0, %v3532_v48 }
 0x666   : > { %2901 = vmatpush1.msk.msra.mxu1 %vm577_vm0, %v3534_v51  ;;  %2230 = vmatprep.mubr.f32.mxu0 %v3200_v0 }
 0x667   : > { %2301 = vmatprep.mubr.f32.mxu1 %v3200_v0  ;;  %2899 = vmatmul.mubr.msk.f32.vlgmr.msra.gmra.mrb[18].mxu0 %vm573_vm1, %v2162_v20 }
 0x668   : > { %2902 = vmatmul.mubr.msk.f32.vlgmr.msra.gmra.mrb[18].mxu1 %vm573_vm1, %v2162_v20  ;;  %2400 = vmatprep.mubr.f32.mxu0 %v3200_v0 }
 0x669   : > { %2471 = vmatprep.mubr.f32.mxu1 %v3200_v0 }
 0x736   : > { %v2036_v21 = vpop.f32.mrb[16].mxu0 }
 0x737   : > { %v2112_v22 = vsub.f32 0.0, %v2036_v21  ;;  %v2038_v23 = vpop.f32.mrb[17].mxu0  ;;  %v2107_v24 = vpop.f32.mrb[16].mxu1 }
 0x738   : > { %v2113_v25 = vsub.f32 0.0, %v2038_v23  ;;  %v2114_v27 = vsub.f32 0.0, %v2107_v24  ;;  %v2109_v28 = vpop.f32.mrb[17].mxu1  ;;  %v2490_v23 = vld [vmem:[%s3719_s10] sm:$0xf] }
 0x739   : > { %v2116_v26 = vmul.f32 1.442695, %v2112_v22  ;;  %v2115_v30 = vsub.f32 0.0, %v2109_v28 }
 0x73a   : > { %v2118_v29 = vmul.f32 1.442695, %v2113_v25  ;;  %v2120_v31 = vmul.f32 1.442695, %v2114_v27  ;;  %v2232_v32 = vpop.f32.mrb[18].mxu0 }
 0x73b   : > { %3010 = vpow2.f32 %v2116_v26  ;;  %v2122_v33 = vmul.f32 1.442695, %v2115_v30  ;;  %v2303_v34 = vpop.f32.mrb[18].mxu1  ;;  %vm2308_vm12 = vcmp.gt.f32.partialorder %v2232_v32, 0.0  ;;  %v2312_v35 = vmul.f32 0.2, %v2232_v32 }
 0x73c   : > { %3012 = vpow2.f32 %v2118_v29  ;;  %v2234_v36 = vpop.f32.mrb[19].mxu0  ;;  %v2305_v37 = vpop.f32.mrb[19].mxu1  ;;  %v2314_v38 = vmul.f32 0.2, %v2303_v34  ;;  %vm2310_vm14 = vcmp.gt.f32.partialorder %v2303_v34, 0.0 }
 0x73d   : > { %3014 = vpow2.f32 %v2120_v31  ;;  %vm2309_vm13 = vcmp.gt.f32.partialorder %v2234_v36, 0.0  ;;  %v2313_v39 = vmul.f32 0.2, %v2234_v36  ;;  %vm2311_vm15 = vcmp.gt.f32.partialorder %v2305_v37, 0.0 }
 0x73e   : > { %3016 = vpow2.f32 %v2122_v33  ;;  %v2315_v40 = vmul.f32 0.2, %v2305_v37  ;;  %v2316_v43 = vsel %vm2308_vm12, %v2232_v32, %v2312_v35  ;;  %v2318_v45 = vsel %vm2310_vm14, %v2303_v34, %v2314_v38 }
 0x73f   : > { %v2317_v41 = vsel %vm2309_vm13, %v2234_v36, %v2313_v39 }
 0x740   : > { %2903 = vmatprep.subr.msk.mxu0 %vm577_vm0, %v2317_v41  ;;  %v2319_v44 = vsel %vm2311_vm15, %v2305_v37, %v2315_v40 }
 0x741   : > { %2906 = vmatprep.subr.msk.mxu1 %vm577_vm0, %v2319_v44  ;;  %2904 = vmatpush1.msk.msra.mxu0 %vm577_vm0, %v2316_v43 }
 0x742   : > { %2907 = vmatpush1.msk.msra.mxu1 %vm577_vm0, %v2318_v45  ;;  %2905 = vmatmul.mubr.msk.f32.vlgmr.msra.gmra.mrb[20].mxu0 %vm573_vm1, %v2320_v42 }
 0x743   : > { %2908 = vmatmul.mubr.msk.f32.vlgmr.msra.gmra.mrb[20].mxu1 %vm573_vm1, %v2320_v42  ;;  %2570 = vmatprep.mubr.f32.mxu0 %v3200_v0 }
 0x744   : > { %2641 = vmatprep.mubr.f32.mxu1 %v3200_v0 }
 0x745   : > { %v3011_v46 = vpop.eup %3010 }
 0x746   : > { %v3013_v47 = vpop.eup %3012  ;;  %v2124_v48 = vadd.f32 1.0, %v3011_v46 }
 0x747   : > { %v3015_v49 = vpop.eup %3014  ;;  %v2125_v50 = vadd.f32 1.0, %v3013_v47 }
 0x748   : > { %v3017_v51 = vpop.eup %3016  ;;  %3018 = vrcp.f32 %v2124_v48  ;;  %v2126_v52 = vadd.f32 1.0, %v3015_v49 }
 0x749   : > { %3020 = vrcp.f32 %v2125_v50  ;;  %v2127_v53 = vadd.f32 1.0, %v3017_v51 }
 0x74a   : > { %3022 = vrcp.f32 %v2126_v52 }
 0x74b   : > { %3024 = vrcp.f32 %v2127_v53 }
 0x752   : > { %v3019_v54 = vpop.eup %3018 }
 0x753   : > { %v3021_v55 = vpop.eup %3020  ;;  %v2136_v56 = vmul.f32 2.0, %v3019_v54 }
 0x754   : > { %v3023_v57 = vpop.eup %3022  ;;  %v2137_v58 = vmul.f32 2.0, %v3021_v55 }
 0x755   : > { %v3025_v59 = vpop.eup %3024  ;;  %v2893_v60 = vadd.f32 -1.0, %v2136_v56  ;;  %v2138_v61 = vmul.f32 2.0, %v3023_v57 }
 0x756   : > { %v2894_v0 = vadd.f32 -1.0, %v2137_v58  ;;  %v2139_v62 = vmul.f32 2.0, %v3025_v59 }
 0x757   : > { %v2144_v63 = vmul.f32 1.442695, %v2893_v60  ;;  %v2895_v3 = vadd.f32 -1.0, %v2138_v61 }
 0x758   : > { %v2146_v4 = vmul.f32 1.442695, %v2894_v0  ;;  %v2896_v5 = vadd.f32 -1.0, %v2139_v62 }
 0x759   : > { %3026 = vpow2.f32 %v2144_v63  ;;  %v2148_v6 = vmul.f32 1.442695, %v2895_v3 }
 0x75a   : > { %3028 = vpow2.f32 %v2146_v4  ;;  %v2150_v7 = vmul.f32 1.442695, %v2896_v5 }
 0x75b   : > { %3030 = vpow2.f32 %v2148_v6 }
 0x75c   : > { %3032 = vpow2.f32 %v2150_v7 }
 0x763   : > { %v3606_v8 = vpop.eup %3026 }
 0x764   : > { %v3608_v9 = vpop.eup %3028 }
 0x765   : > { %v3610_v10 = vpop.eup %3030  ;;  %v2156_v11 = vcombine.low %v3606_v8, %v3608_v9 }
 0x766   : > { %v3614_v12 = vpop.eup %3032 }
 0x767   : > { %v2157_v13 = vcombine.low %v3610_v10, %v3614_v12 }
 0x815   : > { %v2402_v14 = vpop.f32.mrb[20].mxu0 }
 0x816   : > { %v2482_v15 = vmul.f32 0.2, %v2402_v14  ;;  %v2473_v16 = vpop.f32.mrb[20].mxu1  ;;  %v2404_v17 = vpop.f32.mrb[21].mxu0  ;;  %vm2478_vm2 = vcmp.gt.f32.partialorder %v2402_v14, 0.0 }
 0x817   : > { %vm2479_vm3 = vcmp.gt.f32.partialorder %v2404_v17, 0.0  ;;  %v2483_v18 = vmul.f32 0.2, %v2404_v17  ;;  %v2484_v19 = vmul.f32 0.2, %v2473_v16  ;;  %v2475_v20 = vpop.f32.mrb[21].mxu1 }
 0x818   : > { %vm2480_vm4 = vcmp.gt.f32.partialorder %v2473_v16, 0.0  ;;  %vm2481_vm5 = vcmp.gt.f32.partialorder %v2475_v20, 0.0  ;;  %v2485_v21 = vmul.f32 0.2, %v2475_v20  ;;  %v2486_v24 = vsel %vm2478_vm2, %v2402_v14, %v2482_v15 }
 0x819   : > { %v2487_v22 = vsel %vm2479_vm3, %v2404_v17, %v2483_v18  ;;  %v2488_v26 = vsel %vm2480_vm4, %v2473_v16, %v2484_v19 }
 0x81a   : > { %2909 = vmatprep.subr.msk.mxu0 %vm577_vm0, %v2487_v22  ;;  %v2489_v25 = vsel %vm2481_vm5, %v2475_v20, %v2485_v21 }
 0x81b   : > { %2910 = vmatpush1.msk.msra.mxu0 %vm577_vm0, %v2486_v24  ;;  %2912 = vmatprep.subr.msk.mxu1 %vm577_vm0, %v2489_v25 }
 0x81c   : > { %2911 = vmatmul.mubr.msk.f32.vlgmr.msra.gmra.mrb[22].mxu0 %vm573_vm1, %v2490_v23  ;;  %2913 = vmatpush1.msk.msra.mxu1 %vm577_vm0, %v2488_v26 }
 0x81d   : > { %2914 = vmatmul.mubr.msk.f32.vlgmr.msra.gmra.mrb[22].mxu1 %vm573_vm1, %v2490_v23 }
 0x81e   : > { %3107 = shalt.err (!%p3104_p1)
}
 0x81f   : > { %s3108_s25 = scalar_lea.hbm %s3634_s17, 256  ;;  %s3112_s24 = scalar_lea.hbm %s3759_s23, 512 }
 0x820   : > { %p3109_p11 = scmp.ne.s32.totalorder %s3634_s17, %s3108_s25  ;;  %p3113_p4 = scmp.lt.u32.totalorder %s3634_s17, %s3759_s23 }
 0x821   : > { %p3114_p10 = scmp.lt.u32.totalorder %s3112_s24, %s3108_s25  ;;  %p3116_p13 = scmp.lt.u32.totalorder %s3108_s25, %s3634_s17 }
 0x822   : > { %p3110_p12 = pnand %p3109_p11, %p3760_p3 }
 0x823   : > { %p3115_p6 = por %p3114_p10, %p3113_p4 }
 0x824   : > { %p3111_p2 = pneg %p3110_p12 }
 0x825   : > { %p3117_p7 = por %p3116_p13, %p3115_p6 }
 0x827   : > { %p3118_p5 = pnand %p3117_p7, %p3111_p2 }
 0x829   : > { %3121 = shalt.err (!%p3118_p5)
}
 0x82a   : > { %2931 = dma.vmem_to_hbm [thread:$0]  (%p3760_p3), %s2683_s18, 256, %s3634_s17, %s2663_s28   ;;  %v2160_v30 = vmul.f32 %v2156_v11, %v3450_v1  ;;  %v2161_v34 = vmul.f32 %v2157_v13, %v3452_v2 }
 0x82b   : > { %s559_s21 = scalar_lea.vmem [#allocation8], %s3434_s27  ;;  %s3761_s28 = sld [smem:[#allocation22_spill]] }
 0x82c   : > { %s2696_s0 = sshll.u32 %s559_s21, 4  ;;  %s2668_s27 = scalar_lea.sflag [#allocation9], %s3431_s16  ;;  %s3667_s0 = int_to_ptr.vmem [resolvable:$true] %s2696_s0 }
 0x82d   : > { %s3122_s20 = scalar_lea.vmem %s3667_s0, 256  ;;  %s3202_s29 = smov [#allocation8]  }
 0x82e   : > { %p3123_p8 = scmp.ne.s32.totalorder %s3667_s0, %s3122_s20  ;;  %s3126_s24 = sshll.u32 %s3202_s29, 4  ;;  %s3127_s24 = int_to_ptr.vmem [resolvable:$false] %s3126_s24 }
 0x82f   : > { %s3128_s22 = scalar_lea.vmem %s3127_s24, 512  ;;  %p3129_p1 = scmp.lt.s32.totalorder %s3667_s0, %s3127_s24 }
 0x830   : > { %p3124_p9 = pnand %p3123_p8, %p3760_p3  ;;  %p3130_p11 = scmp.lt.s32.totalorder %s3128_s22, %s3122_s20 }
 0x831   : > { %s3665_s25 = scalar_lea.hbm %s3761_s28, %s2925_s26 }
 0x832   : > { %p3125_p0 = pneg %p3124_p9  ;;  %p3131_p12 = por %p3130_p11, %p3129_p1 }
 0x834   : > { %p3132_p2 = pnand %p3131_p12, %p3125_p0 }
 0x8ef   : > { %v2572_v27 = vpop.f32.mrb[22].mxu0 }
 0x8f0   : > { %v2574_v28 = vpop.f32.mrb[23].mxu0  ;;  %v2643_v29 = vpop.f32.mrb[22].mxu1 }
 0x8f1   : > { %v2652_v31 = vcombine.low %v2572_v27, %v2574_v28  ;;  %v2645_v32 = vpop.f32.mrb[23].mxu1 }
 0x8f2   : > { %v2653_v35 = vcombine.low %v2643_v29, %v2645_v32 }
 0x8f3   : > { %v2656_v33 = vadd.f32 %v2652_v31, %v2160_v30 }
 0x8f4   : > { %v2657_v36 = vadd.f32 %v2653_v35, %v2161_v34 }
 0x8f5   : > { %2660 = vst [vmem:[%s559_s21] sm:$0xff] %v2656_v33 }
 0x8f6   : > { %2661 = vst [vmem:[%s559_s21 + $0x8] sm:$0xff] %v2657_v36 }
 0x8f7   : > { %3135 = shalt.err (!%p3132_p2)
}
 0x8f8   : > { %s3136_s16 = scalar_lea.hbm %s3665_s25, 256  ;;  %s3140_s14 = scalar_lea.hbm %s3761_s28, 512 }
 0x8f9   : > { %p3137_p4 = scmp.ne.s32.totalorder %s3665_s25, %s3136_s16  ;;  %p3141_p13 = scmp.lt.u32.totalorder %s3665_s25, %s3761_s28 }
 0x8fa   : > { %p3142_p7 = scmp.lt.u32.totalorder %s3140_s14, %s3136_s16  ;;  %p3144_p8 = scmp.lt.u32.totalorder %s3136_s16, %s3665_s25 }
 0x8fb   : > { %p3138_p10 = pnand %p3137_p4, %p3760_p3 }
 0x8fc   : > { %p3143_p5 = por %p3142_p7, %p3141_p13 }
 0x8fd   : > { %p3139_p6 = pneg %p3138_p10 }
 0x8fe   : > { %p3145_p9 = por %p3144_p8, %p3143_p5 }
 0x900   : > { %p3146_p0 = pnand %p3145_p9, %p3139_p6 }
 0x902   : > { %3149 = shalt.err (!%p3146_p0)
}
 0x903   : > { %2932 = dma.vmem_to_hbm [thread:$0]  (%p3760_p3), %s3667_s0, 256, %s3665_s25, %s2668_s27  }
 0x904 PF: > { %s3762_s17 = sld [smem:[#allocation14_spill]]  ;;  %s3763_s20 = sld [smem:[#allocation19_spill]] }
 0x905   : > { %s3764_s29 = sld [smem:[#allocation16_spill]] }
 0x90a   : > { %s2708_s24 = sand.u32 1, %s3762_s17   ;;  %p3765_p1 = scmp.ne.s32.totalorder %s3763_s20, 0 }
 0x90b   : > { %p3766_p11 = scmp.ge.s32.totalorder %s3764_s29, 2  ;;  %s2709_s22 = scalar_lea.sflag [#allocation4], %s2708_s24 }
 0x90d   : > { %p2943_p12 = pnand %p3766_p11, %p3765_p1 }
 0x90f   : > { %3175 = dma.done.wait (!%p2943_p12), %s2709_s22, 256  }
 0x910   : > { %3177 = vsyncadd (!%p2943_p12), %s2709_s22, 4294967040  ;;  %s2718_s16 = scalar_lea.sflag [#allocation9], %s2708_s24 }
 0x911   : > { %3179 = dma.done.wait (!%p2943_p12), %s2718_s16, 256  }
 0x912   : > { %3181 = vsyncadd (!%p2943_p12), %s2718_s16, 4294967040  ;;  %s3767_s21 = sld [smem:[#allocation17_spill]]  ;;  %s3768_s30 = sld [smem:[#allocation15_spill]] }
 0x913   : > { %s3769_s20 = sld [smem:[#allocation18_spill]]  ;;  %s3770_s18 = smov %s3188_s19 }
 0x918   : > { %p35_p3 = scmp.ge.s32.totalorder %s3767_s21, 4   ;;  %s3771_s19 = smov %s3768_s30 }
 0x91a   :  { %37 = sbr.rel (!%p35_p3) target bundleno = 13 (0xd), region = 151 }
 0x921   :  { %2723 = vsyncpa [#allocation3], 1 }
 0x922   :  { %2725 = vsyncpa [#allocation3 + $0x1], 1 }
 0x923   :  { %2726 = vsyncpa [#allocation6], 1 }
 0x924   :  { %2728 = vsyncpa [#allocation6 + $0x1], 1 }
 0x925   :  { %2729 = vsyncpa [#allocation4], 1 }
 0x926   :  { %2731 = vsyncpa [#allocation4 + $0x1], 1 }
 0x927   :  { %2732 = vsyncpa [#allocation9], 1 }
 0x928   :  { %2734 = vsyncpa [#allocation9 + $0x1], 1 }

</bundles_post_ra>
